<compile_context>
chip_gen: v6e
topology: v6e:2x2x1
jax: 0.10.0
libtpu: 0.0.40
codegen_flags: <defaults>
</compile_context>

<pallas_src>
import functools

import jax
import jax.numpy as jnp
from jax.experimental import pallas as pl
from jax.experimental.pallas import tpu as pltpu


H_PAD = 128   # lane-dense width used for every layer output
TB = 256      # batch tile for the large-batch (grid) path; multiple of 8


# ---------------------------------------------------------------------------
# Kernel
# ---------------------------------------------------------------------------
def actor_kernel(x_ref, w1_ref, b1_ref, w2_ref, w3_ref, out_ref):
    """Fused 3-layer MLP on one batch tile.

    All operands are f32, lane-dense (last dim = 128 except x, which keeps its
    native 2*state_size lanes). Biases b2/b3 are pre-folded into w2/w3 via a
    constant-1 carrier lane established by b1_ref.
    """
    # fc1 + ReLU   (MXU matmul, f32 accumulation). b1_ref is (1, 128) and also
    # seeds the carrier lane (value 1.0 at lane h1).
    h1 = jnp.dot(x_ref[...], w1_ref[...], preferred_element_type=jnp.float32)
    h1 = jnp.maximum(h1 + b1_ref[...], 0.0)

    # fc2 + ReLU. Bias b2 lives in row `h1` of w2_ref; the carrier lane is
    # propagated to lane `h2` of the result (w2_ref[h1, h2] == 1).
    h2 = jnp.dot(h1, w2_ref[...], preferred_element_type=jnp.float32)
    h2 = jnp.maximum(h2, 0.0)

    # fc3 + tanh. Bias b3 lives in row `h2` of w3_ref. Padded lanes are 0 ->
    # tanh(0) = 0; real actions occupy lanes [0, action_size).
    h3 = jnp.dot(h2, w3_ref[...], preferred_element_type=jnp.float32)
    out_ref[...] = jnp.tanh(h3).astype(out_ref.dtype)


# ---------------------------------------------------------------------------
# pallas_call wrappers
# ---------------------------------------------------------------------------
def _actor_call_nogrid(xp, w1p, b1p, w2p, w3p):
    """Small batch: no grid, no pipeline — everything resident in VMEM."""
    bp = xp.shape[0]
    vmem = lambda: pl.BlockSpec(memory_space=pltpu.MemorySpace.VMEM)
    return pl.pallas_call(
        actor_kernel,
        out_shape=jax.ShapeDtypeStruct((bp, H_PAD), jnp.float32),
        in_specs=[vmem(), vmem(), vmem(), vmem(), vmem()],
        out_specs=vmem(),
    )(xp, w1p, b1p, w2p, w3p)


def _actor_call_tiled(xp, w1p, b1p, w2p, w3p, tb):
    """Large batch: tile the batch axis; weights stay resident across the grid.
    The batch axis is 'parallel' so both TensorCores are used on v7x."""
    bp, k = xp.shape
    grid = (bp // tb,)
    return pl.pallas_call(
        actor_kernel,
        out_shape=jax.ShapeDtypeStruct((bp, H_PAD), jnp.float32),
        grid_spec=pltpu.PrefetchScalarGridSpec(
            num_scalar_prefetch=0,
            grid=grid,
            in_specs=[
                pl.BlockSpec((tb, k), lambda i: (i, 0)),
                pl.BlockSpec(w1p.shape, lambda i: (0, 0)),
                pl.BlockSpec(b1p.shape, lambda i: (0, 0)),
                pl.BlockSpec(w2p.shape, lambda i: (0, 0)),
                pl.BlockSpec(w3p.shape, lambda i: (0, 0)),
            ],
            out_specs=pl.BlockSpec((tb, H_PAD), lambda i: (i, 0)),
        ),
        compiler_params=pltpu.CompilerParams(
            dimension_semantics=("parallel",)
        ),
    )(xp, w1p, b1p, w2p, w3p)


@functools.partial(jax.jit, static_argnames=("action_size",))
def actor_forward(x, w1p, b1p, w2p, w3p, *, action_size):
    """Run the fused actor MLP. Pads batch (sublane alignment / tile multiple),
    dispatches to the grid-free or batch-tiled path, slices real outputs."""
    b = x.shape[0]
    if b <= TB:
        bp = max(8, ((b + 7) // 8) * 8)
        xp = x if bp == b else jnp.pad(x, ((0, bp - b), (0, 0)))
        out = _actor_call_nogrid(xp, w1p, b1p, w2p, w3p)
    else:
        bp = ((b + TB - 1) // TB) * TB
        xp = x if bp == b else jnp.pad(x, ((0, bp - b), (0, 0)))
        out = _actor_call_tiled(xp, w1p, b1p, w2p, w3p, TB)
    return out[:b, :action_size]


# ---------------------------------------------------------------------------
# Parameter init (matches the PyTorch module's scheme) and one-time packing
# ---------------------------------------------------------------------------
def init_actor_params(key, state_size, action_size, hidden_units):
    """fc1/fc2 weights ~ U(-1/sqrt(out_features), ...) per hidden_init
    (fan_in = weight.size()[0] of PyTorch's [out,in] layout), fc3 weights
    ~ U(-3e-3, 3e-3). Biases keep nn.Linear's default U(+-1/sqrt(fan_in)).
    Weights stored [in, out]."""
    inp_dim = 2 * state_size
    h1, h2 = hidden_units

    k1, k2, k3, kb1, kb2, kb3 = jax.random.split(key, 6)

    lim1 = 1.0 / jnp.sqrt(jnp.float32(h1))
    lim2 = 1.0 / jnp.sqrt(jnp.float32(h2))
    lim3 = 3e-3

    w1 = jax.random.uniform(k1, (inp_dim, h1), jnp.float32, -lim1, lim1)
    w2 = jax.random.uniform(k2, (h1, h2), jnp.float32, -lim2, lim2)
    w3 = jax.random.uniform(k3, (h2, action_size), jnp.float32, -lim3, lim3)

    bl1 = 1.0 / jnp.sqrt(jnp.float32(inp_dim))
    bl2 = 1.0 / jnp.sqrt(jnp.float32(h1))
    bl3 = 1.0 / jnp.sqrt(jnp.float32(h2))
    b1 = jax.random.uniform(kb1, (1, h1), jnp.float32, -bl1, bl1)
    b2 = jax.random.uniform(kb2, (1, h2), jnp.float32, -bl2, bl2)
    b3 = jax.random.uniform(kb3, (1, action_size), jnp.float32, -bl3, bl3)

    return w1, b1, w2, b2, w3, b3


def pack_actor_params(w1, b1, w2, b2, w3, b3):
    """One-time packing into lane-dense (128-wide) arrays with b2/b3 folded in.

    Carrier construction:
      b1_packed[0, h1]      = 1.0  -> layer-1 output lane h1 is 1.0 after ReLU
      w2_packed[h1, :h2]    = b2   -> bias-2 enters via the carrier
      w2_packed[h1, h2]     = 1.0  -> layer-2 output lane h2 is 1.0 after ReLU
      w3_packed[h2, :A]     = b3   -> bias-3 enters via the carrier
    All other padded entries are zero, so padded lanes never perturb results.
    """
    inp_dim, h1 = w1.shape
    _, h2 = w2.shape
    _, a = w3.shape
    assert h1 + 1 <= H_PAD and h2 + 1 <= H_PAD and a <= H_PAD

    w1p = jnp.zeros((inp_dim, H_PAD), jnp.float32).at[:, :h1].set(w1)

    b1p = jnp.zeros((1, H_PAD), jnp.float32).at[:, :h1].set(b1.reshape(1, h1))
    b1p = b1p.at[0, h1].set(1.0)

    w2p = jnp.zeros((H_PAD, H_PAD), jnp.float32)
    w2p = w2p.at[:h1, :h2].set(w2)
    w2p = w2p.at[h1, :h2].set(b2.reshape(h2))
    w2p = w2p.at[h1, h2].set(1.0)

    w3p = jnp.zeros((H_PAD, H_PAD), jnp.float32)
    w3p = w3p.at[:h2, :a].set(w3)
    w3p = w3p.at[h2, :a].set(b3.reshape(a))

    return w1p, b1p, w2p, w3p


def actor_reference(x, w1, b1, w2, b2, w3, b3):
    """Pure-JAX reference for correctness checking."""
    h1 = jax.nn.relu(x @ w1 + b1)
    h2 = jax.nn.relu(h1 @ w2 + b2)
    return jnp.tanh(h2 @ w3 + b3)


# ---------------------------------------------------------------------------
# Self-test
# ---------------------------------------------------------------------------
if __name__ == "__main__":
    state_size = 16            # -> input dim = 2 * state_size = 32
    action_size = 4
    hidden_units = (64, 32)
    batch = 8

    key = jax.random.PRNGKey(0)
    kx, kp = jax.random.split(key)

    x = jax.random.normal(kx, (batch, 2 * state_size), dtype=jnp.float32)
    params = init_actor_params(kp, state_size, action_size, hidden_units)
    packed = pack_actor_params(*params)

    # Small batch: grid-free, whole problem in VMEM.
    out = actor_forward(x, *packed, action_size=action_size)
    out = jax.block_until_ready(out)
    ref = actor_reference(x, *params)
    assert out.shape == (batch, action_size)
    assert jnp.allclose(out, ref, atol=1e-5, rtol=1e-5), \
        "Pallas output mismatch vs reference (small batch)"

    # Large batch: exercises the batch-tiled 'parallel' grid path (+ padding).
    big_batch = 515
    xb = jax.random.normal(jax.random.PRNGKey(1), (big_batch, 2 * state_size),
                           dtype=jnp.float32)
    outb = actor_forward(xb, *packed, action_size=action_size)
    outb = jax.block_until_ready(outb)
    refb = actor_reference(xb, *params)
    assert outb.shape == (big_batch, action_size)
    assert jnp.allclose(outb, refb, atol=1e-5, rtol=1e-5), \
        "Pallas output mismatch vs reference (tiled batch)"

    print("KERNEL_OK")
</pallas_src>

<mosaic_0001>
module attributes {stable_mosaic.version = 11 : i64} {
  func.func @actor_kernel(%arg0: memref<8x32xf32, #tpu.memory_space<vmem>>, %arg1: memref<32x128xf32, #tpu.memory_space<vmem>>, %arg2: memref<1x128xf32, #tpu.memory_space<vmem>>, %arg3: memref<128x128xf32, #tpu.memory_space<vmem>>, %arg4: memref<128x128xf32, #tpu.memory_space<vmem>>, %arg5: memref<8x128xf32, #tpu.memory_space<vmem>>) attributes {dimension_semantics = [], scalar_prefetch = 0 : i64, scratch_operands = 0 : i64, tpu.core_type = #tpu.core_type<tc>} {
    %c0 = arith.constant 0 : index
    %c0_0 = arith.constant 0 : index
    %0 = vector.load %arg0[%c0, %c0_0] : memref<8x32xf32, #tpu.memory_space<vmem>>, vector<8x32xf32>
    %c0_1 = arith.constant 0 : index
    %c0_2 = arith.constant 0 : index
    %1 = vector.load %arg1[%c0_1, %c0_2] : memref<32x128xf32, #tpu.memory_space<vmem>>, vector<32x128xf32>
    %cst = arith.constant dense<0.000000e+00> : vector<8x128xf32>
    %2 = tpu.matmul %0, %1, %cst {dimension_numbers = #tpu.dot_dimension_numbers<[1], [0], [0], [1], [0, 0, 1, 1], [], []>} : vector<8x32xf32>, vector<32x128xf32>, vector<8x128xf32> -> vector<8x128xf32>
    %c0_3 = arith.constant 0 : index
    %c0_4 = arith.constant 0 : index
    %3 = vector.load %arg2[%c0_3, %c0_4] : memref<1x128xf32, #tpu.memory_space<vmem>>, vector<1x128xf32>
    %4 = vector.broadcast %3 : vector<1x128xf32> to vector<8x128xf32>
    %5 = arith.addf %2, %4 : vector<8x128xf32>
    %cst_5 = arith.constant 0.000000e+00 : f32
    %6 = vector.broadcast %cst_5 : f32 to vector<8x128xf32>
    %7 = arith.maximumf %5, %6 : vector<8x128xf32>
    %c0_6 = arith.constant 0 : index
    %c0_7 = arith.constant 0 : index
    %8 = vector.load %arg3[%c0_6, %c0_7] : memref<128x128xf32, #tpu.memory_space<vmem>>, vector<128x128xf32>
    %cst_8 = arith.constant dense<0.000000e+00> : vector<8x128xf32>
    %9 = tpu.matmul %7, %8, %cst_8 {dimension_numbers = #tpu.dot_dimension_numbers<[1], [0], [0], [1], [0, 0, 1, 1], [], []>} : vector<8x128xf32>, vector<128x128xf32>, vector<8x128xf32> -> vector<8x128xf32>
    %cst_9 = arith.constant 0.000000e+00 : f32
    %10 = vector.broadcast %cst_9 : f32 to vector<8x128xf32>
    %11 = arith.maximumf %9, %10 : vector<8x128xf32>
    %c0_10 = arith.constant 0 : index
    %c0_11 = arith.constant 0 : index
    %12 = vector.load %arg4[%c0_10, %c0_11] : memref<128x128xf32, #tpu.memory_space<vmem>>, vector<128x128xf32>
    %cst_12 = arith.constant dense<0.000000e+00> : vector<8x128xf32>
    %13 = tpu.matmul %11, %12, %cst_12 {dimension_numbers = #tpu.dot_dimension_numbers<[1], [0], [0], [1], [0, 0, 1, 1], [], []>} : vector<8x128xf32>, vector<128x128xf32>, vector<8x128xf32> -> vector<8x128xf32>
    %14 = math.tanh %13 : vector<8x128xf32>
    %c0_13 = arith.constant 0 : index
    %c0_14 = arith.constant 0 : index
    %15 = vector.load %arg5[%c0_13, %c0_14] : memref<8x128xf32, #tpu.memory_space<vmem>>, vector<8x128xf32>
    tpu.vector_store %arg5[%c0_13, %c0_14], %14 {strides = array<i32>} : memref<8x128xf32, #tpu.memory_space<vmem>>, vector<8x128xf32>,
    return
  }
}

</mosaic_0001>

<bundles_post_ra>
// kernel: actor_forward.1
= control target key start
LH: loop header
LB: loop body
LE: loop exit
PB: predicated region body
PF: predicated region fallthrough
CT: control target
= control target key end

     0   :  { %10 = vsyncpa [#allocation3], 0  ;;  %s667_s0 = inlined_call_operand.hbm [shape: f32[8,32], index: 0, kind: input, shape index: {}]   ;;  %s668_s1 = inlined_call_operand.hbm [shape: f32[32,128], index: 1, kind: input, shape index: {}]   ;;  %s669_s2 = inlined_call_operand.vmem [shape: f32[1,128], index: 2, kind: input, shape index: {}]   ;;  %s670_s3 = inlined_call_operand.hbm [shape: f32[128,128], index: 3, kind: input, shape index: {}]   ;;  %s671_s4 = inlined_call_operand.hbm [shape: f32[128,128], index: 4, kind: input, shape index: {}]   ;;  %s672_s5 = inlined_call_operand.vmem [shape: f32[8,128], index: 5, kind: output, shape index: {}]  }
   0x1   :  { %11 = vsyncpa [#allocation5], 0 }
   0x2   :  { %12 = vsyncpa [#allocation8], 0  ;;  %s560_s18 = smov [#allocation4]  }
   0x3   :  { %s28_s19 = sshll.u32 %s560_s18, 4  ;;  %s29_s19 = int_to_ptr.vmem [resolvable:$true] %s28_s19 }
   0x4   :  { %s482_s20 = scalar_lea.vmem %s29_s19, 512  ;;  %p487_p1 = scmp.lt.s32.totalorder %s29_s19, %s29_s19 }
   0x5   :  { %p483_p0 = scmp.ne.s32.totalorder %s29_s19, %s482_s20  ;;  %p488_p2 = scmp.lt.s32.totalorder %s482_s20, %s482_s20 }
   0x7   :  { %p489_p3 = por %p488_p2, %p487_p1 }
   0x9   :  { %p490_p4 = pnand %p489_p3, %p483_p0 }
   0xb   :  { %493 = shalt.err (!%p490_p4)
}
   0xc   :  { %s561_s21 = smov 128   ;;  %s562_s22 = smov 8  }
   0xd   :  { %34 = dma.hbm_to_vmem [thread:$0]  %s668_s1, 512, %s29_s19, [#allocation5], %s561_s21, %s561_s21, %s562_s22  }
   0xe   :  { %s563_s25 = smov [#allocation2]   ;;  %s564_s27 = smov [#allocation6]  }
   0xf   :  { %s19_s26 = sshll.u32 %s563_s25, 4  ;;  %s42_s28 = sshll.u32 %s564_s27, 4  ;;  %s20_s26 = int_to_ptr.vmem [resolvable:$true] %s19_s26  ;;  %s43_s28 = int_to_ptr.vmem [resolvable:$true] %s42_s28 }
  0x10   :  { %s502_s29 = scalar_lea.vmem %s20_s26, 128  ;;  %p507_p6 = scmp.lt.s32.totalorder %s20_s26, %s20_s26 }
  0x11   :  { %p503_p5 = scmp.ne.s32.totalorder %s20_s26, %s502_s29  ;;  %p508_p7 = scmp.lt.s32.totalorder %s502_s29, %s502_s29 }
  0x13   :  { %p509_p8 = por %p508_p7, %p507_p6 }
  0x15   :  { %p510_p9 = pnand %p509_p8, %p503_p5 }
  0x17   :  { %513 = shalt.err (!%p510_p9)
}
  0x18   :  { %22 = dma.hbm_to_vmem [thread:$0]  %s667_s0, 128, %s20_s26, [#allocation3]  }
  0x19   :  { %s522_s7 = scalar_lea.vmem %s43_s28, 2048  ;;  %p527_p11 = scmp.lt.s32.totalorder %s43_s28, %s43_s28 }
  0x1a   :  { %p523_p10 = scmp.ne.s32.totalorder %s43_s28, %s522_s7  ;;  %p528_p12 = scmp.lt.s32.totalorder %s522_s7, %s522_s7 }
  0x1c   :  { %p529_p13 = por %p528_p12, %p527_p11 }
  0x1e   :  { %p530_p0 = pnand %p529_p13, %p523_p10 }
  0x20   :  { %533 = shalt.err (!%p530_p0)
}
  0x21   :  { %48 = dma.hbm_to_vmem [thread:$0]  %s670_s3, 2048, %s43_s28, [#allocation5], %s561_s21, %s561_s21, %s562_s22  }
  0x22   :  { %s565_s9 = smov [#allocation7]  }
  0x23   :  { %s54_s10 = sshll.u32 %s565_s9, 4  ;;  %s55_s10 = int_to_ptr.vmem [resolvable:$true] %s54_s10 }
  0x24   :  { %s542_s11 = scalar_lea.vmem %s55_s10, 2048  ;;  %p547_p2 = scmp.lt.s32.totalorder %s55_s10, %s55_s10 }
  0x25   :  { %p543_p1 = scmp.ne.s32.totalorder %s55_s10, %s542_s11  ;;  %p548_p3 = scmp.lt.s32.totalorder %s542_s11, %s542_s11 }
  0x27   :  { %p549_p4 = por %p548_p3, %p547_p2 }
  0x29   :  { %p550_p5 = pnand %p549_p4, %p543_p1 }
  0x2b   :  { %553 = shalt.err (!%p550_p5)
}
  0x2c   :  { %60 = dma.hbm_to_vmem [thread:$0]  %s671_s4, 2048, %s55_s10, [#allocation8], %s561_s21, %s561_s21, %s562_s22  }
  0x2d   :  { %554 = dma.done.wait [#allocation3], 128  }
  0x2e   :  { %555 = vsyncadd [#allocation3], 4294967168 }
  0x2f   :  { %556 = dma.done.wait [#allocation5], 2560  }
  0x30   :  { %557 = vsyncadd [#allocation5], 4294964736 }
  0x31   :  { %558 = dma.done.wait [#allocation8], 2048  }
  0x32   :  { %559 = vsyncadd [#allocation8], 4294965248  ;;  %v566_v0 = vmov 0.0   ;;  %vm567_vm0 = vmmov 0   ;;  %v77_v1 = vld [vmem:[#allocation4 + $0x18] sm:$0xff]  ;;  %v76_v2 = vld [vmem:[#allocation4 + $0x10] sm:$0xff] }
  0x33   :  { %383 = vmatprep.subr.mxu0 %v566_v0  ;;  %391 = vmatprep.mubr.msk.f32.mxu0 %vm567_vm0, %v566_v0  ;;  %v175_v3 = vld [vmem:[#allocation6 + $0x78] sm:$0xff]  ;;  %v75_v4 = vld [vmem:[#allocation4 + $0x8] sm:$0xff]  ;;  %v174_v5 = vld [vmem:[#allocation6 + $0x70] sm:$0xff]  ;;  %vm85_vm1 = vcmask 261120  }
  0x34   :  { %394 = vmatprep.subr.mxu1 %v566_v0  ;;  %426 = vmatprep.mubr.msk.f32.mxu1 %vm567_vm0, %v566_v0  ;;  %v173_v6 = vld [vmem:[#allocation6 + $0x68] sm:$0xff]  ;;  %v74_v7 = vld [vmem:[#allocation4] sm:$0xff]  ;;  %v73_v8 = vld [vmem:[#allocation2] sm:$0xff] }
  0x35   :  { %384 = vmatpush3.msra.mxu0 %v77_v1  ;;  %395 = vmatpush3.msra.mxu1 %v175_v3  ;;  %v172_v9 = vld [vmem:[#allocation6 + $0x60] sm:$0xff]  ;;  %v171_v10 = vld [vmem:[#allocation6 + $0x58] sm:$0xff]  ;;  %v170_v11 = vld [vmem:[#allocation6 + $0x50] sm:$0xff] }
  0x36   :  { %385 = vmatprep.subr.mxu0 %v566_v0  ;;  %396 = vmatprep.subr.mxu1 %v566_v0  ;;  %v169_v12 = vld [vmem:[#allocation6 + $0x48] sm:$0xff]  ;;  %v168_v13 = vld [vmem:[#allocation6 + $0x40] sm:$0xff]  ;;  %v167_v14 = vld [vmem:[#allocation6 + $0x38] sm:$0xff] }
  0x37   :  { %386 = vmatpush3.msra.mxu0 %v76_v2  ;;  %397 = vmatpush3.msra.mxu1 %v174_v5  ;;  %v166_v15 = vld [vmem:[#allocation6 + $0x30] sm:$0xff]  ;;  %v165_v16 = vld [vmem:[#allocation6 + $0x28] sm:$0xff]  ;;  %v164_v17 = vld [vmem:[#allocation6 + $0x20] sm:$0xff] }
  0x38   :  { %387 = vmatprep.subr.mxu0 %v566_v0  ;;  %398 = vmatprep.subr.mxu1 %v566_v0  ;;  %v163_v18 = vld [vmem:[#allocation6 + $0x18] sm:$0xff]  ;;  %v162_v19 = vld [vmem:[#allocation6 + $0x10] sm:$0xff]  ;;  %v161_v20 = vld [vmem:[#allocation6 + $0x8] sm:$0xff] }
  0x39   :  { %388 = vmatpush3.msra.mxu0 %v75_v4  ;;  %399 = vmatpush3.msra.mxu1 %v173_v6  ;;  %v160_v21 = vld [vmem:[#allocation6] sm:$0xff]  ;;  %v262_v22 = vld [vmem:[#allocation7 + $0x78] sm:$0xff]  ;;  %v261_v23 = vld [vmem:[#allocation7 + $0x70] sm:$0xff] }
  0x3a   :  { %389 = vmatprep.subr.mxu0 %v566_v0  ;;  %400 = vmatprep.subr.mxu1 %v566_v0  ;;  %v260_v24 = vld [vmem:[#allocation7 + $0x68] sm:$0xff]  ;;  %v259_v25 = vld [vmem:[#allocation7 + $0x60] sm:$0xff]  ;;  %v258_v26 = vld [vmem:[#allocation7 + $0x58] sm:$0xff] }
  0x3b   :  { %390 = vmatpush3.msra.mxu0 %v74_v7  ;;  %401 = vmatpush3.msra.mxu1 %v172_v9  ;;  %v257_v27 = vld [vmem:[#allocation7 + $0x50] sm:$0xff]  ;;  %v256_v28 = vld [vmem:[#allocation7 + $0x48] sm:$0xff]  ;;  %v255_v29 = vld [vmem:[#allocation7 + $0x40] sm:$0xff] }
  0x3c   :  { %392 = vmatmul.mubr.msk.f32.vlgmr.msra.gmra.mxu0 %vm85_vm1, %v73_v8  ;;  %402 = vmatprep.subr.mxu1 %v566_v0  ;;  %v254_v30 = vld [vmem:[#allocation7 + $0x38] sm:$0xff]  ;;  %v253_v31 = vld [vmem:[#allocation7 + $0x30] sm:$0xff]  ;;  %v252_v32 = vld [vmem:[#allocation7 + $0x28] sm:$0xff] }
  0x3d   :  { %429 = vmatprep.subr.mxu0 %v566_v0  ;;  %403 = vmatpush3.msra.mxu1 %v171_v10  ;;  %v251_v33 = vld [vmem:[#allocation7 + $0x20] sm:$0xff]  ;;  %v250_v34 = vld [vmem:[#allocation7 + $0x18] sm:$0xff]  ;;  %v249_v35 = vld [vmem:[#allocation7 + $0x10] sm:$0xff] }
  0x3e   :  { %461 = vmatprep.mubr.msk.f32.mxu0 %vm567_vm0, %v566_v0  ;;  %404 = vmatprep.subr.mxu1 %v566_v0  ;;  %v342_v36 = vld [vmem:[%s669_s2] ss:$0 sm:$0xff]  ;;  %v248_v41 = vld [vmem:[#allocation7 + $0x8] sm:$0xff]  ;;  %v247_v42 = vld [vmem:[#allocation7] sm:$0xff] }
  0x3f   :  { %405 = vmatpush3.msra.mxu1 %v170_v11  ;;  %430 = vmatpush3.msra.mxu0 %v262_v22 }
  0x40   :  { %406 = vmatprep.subr.mxu1 %v566_v0  ;;  %431 = vmatprep.subr.mxu0 %v566_v0 }
  0x41   :  { %407 = vmatpush3.msra.mxu1 %v169_v12  ;;  %432 = vmatpush3.msra.mxu0 %v261_v23 }
  0x42   :  { %408 = vmatprep.subr.mxu1 %v566_v0  ;;  %433 = vmatprep.subr.mxu0 %v566_v0 }
  0x43   :  { %409 = vmatpush3.msra.mxu1 %v168_v13  ;;  %434 = vmatpush3.msra.mxu0 %v260_v24 }
  0x44   :  { %410 = vmatprep.subr.mxu1 %v566_v0  ;;  %435 = vmatprep.subr.mxu0 %v566_v0 }
  0x45   :  { %411 = vmatpush3.msra.mxu1 %v167_v14  ;;  %436 = vmatpush3.msra.mxu0 %v259_v25 }
  0x46   :  { %412 = vmatprep.subr.mxu1 %v566_v0  ;;  %437 = vmatprep.subr.mxu0 %v566_v0 }
  0x47   :  { %413 = vmatpush3.msra.mxu1 %v166_v15  ;;  %438 = vmatpush3.msra.mxu0 %v258_v26 }
  0x48   :  { %414 = vmatprep.subr.mxu1 %v566_v0  ;;  %439 = vmatprep.subr.mxu0 %v566_v0 }
  0x49   :  { %415 = vmatpush3.msra.mxu1 %v165_v16  ;;  %440 = vmatpush3.msra.mxu0 %v257_v27 }
  0x4a   :  { %416 = vmatprep.subr.mxu1 %v566_v0  ;;  %441 = vmatprep.subr.mxu0 %v566_v0 }
  0x4b   :  { %417 = vmatpush3.msra.mxu1 %v164_v17  ;;  %442 = vmatpush3.msra.mxu0 %v256_v28 }
  0x4c   :  { %418 = vmatprep.subr.mxu1 %v566_v0  ;;  %443 = vmatprep.subr.mxu0 %v566_v0 }
  0x4d   :  { %419 = vmatpush3.msra.mxu1 %v163_v18  ;;  %444 = vmatpush3.msra.mxu0 %v255_v29 }
  0x4e   :  { %420 = vmatprep.subr.mxu1 %v566_v0  ;;  %445 = vmatprep.subr.mxu0 %v566_v0 }
  0x4f   :  { %421 = vmatpush3.msra.mxu1 %v162_v19  ;;  %446 = vmatpush3.msra.mxu0 %v254_v30 }
  0x50   :  { %422 = vmatprep.subr.mxu1 %v566_v0  ;;  %447 = vmatprep.subr.mxu0 %v566_v0 }
  0x51   :  { %423 = vmatpush3.msra.mxu1 %v161_v20  ;;  %448 = vmatpush3.msra.mxu0 %v253_v31 }
  0x52   :  { %424 = vmatprep.subr.mxu1 %v566_v0  ;;  %449 = vmatprep.subr.mxu0 %v566_v0 }
  0x53   :  { %425 = vmatpush3.msra.mxu1 %v160_v21  ;;  %450 = vmatpush3.msra.mxu0 %v252_v32 }
  0x54   :  { %451 = vmatprep.subr.mxu0 %v566_v0 }
  0x55   :  { %452 = vmatpush3.msra.mxu0 %v251_v33 }
  0x56   :  { %453 = vmatprep.subr.mxu0 %v566_v0 }
  0x57   :  { %454 = vmatpush3.msra.mxu0 %v250_v34 }
  0x58   :  { %455 = vmatprep.subr.mxu0 %v566_v0 }
  0x59   :  { %456 = vmatpush3.msra.mxu0 %v249_v35 }
  0x5a   :  { %457 = vmatprep.subr.mxu0 %v566_v0 }
  0x5b   :  { %458 = vmatpush3.msra.mxu0 %v248_v41 }
  0x5c   :  { %459 = vmatprep.subr.mxu0 %v566_v0 }
  0x5d   :  { %460 = vmatpush3.msra.mxu0 %v247_v42 }
  0xfc   :  { %v155_v37 = vpop.f32.mrf.mxu0 }
  0xfd   :  { %v156_v38 = vadd.f32 %v342_v36, %v155_v37 }
  0xfe   :  { %v393_v39 = vpop.f32.mrf.mxu0 }
  0xff   :  { %v159_v40 = vmax.f32 %v156_v38, 0.0 }
 0x101   :  { %427 = vmatmul.mubr.f32.vlgmr.msra.gmra.mxu1 %v159_v40 }
 0x1c1   :  { %v242_v43 = vpop.f32.mrf.mxu1 }
 0x1c2   :  { %v246_v44 = vmax.f32 %v242_v43, 0.0 }
 0x1c3   :  { %v428_v45 = vpop.f32.mrf.mxu1 }
 0x1c4   :  { %462 = vmatmul.mubr.f32.vlgmr.msra.gmra.mxu0 %v246_v44 }
 0x284   :  { %v329_v46 = vpop.f32.mrf.mxu0 }
 0x285   :  { %472 = vtanh.f32 %v329_v46 }
 0x286   :  { %v463_v47 = vpop.f32.mrf.mxu0 }
 0x292   :  { %v473_v48 = vpop.eup %472 }
 0x293   :  { %334 = vst [vmem:[%s672_s5] sm:$0xff] %v473_v48 }
 0x294   :  { %339 = vsyncpa [#allocation3], 1 }
 0x295   :  { %340 = vsyncpa [#allocation5], 1 }
 0x296   :  { %341 = vsyncpa [#allocation8], 1 }

</bundles_post_ra>
